<compile_context>
chip_gen: v6e
topology: v6e:2x2x1
jax: 0.10.0
libtpu: 0.0.40
codegen_flags: <defaults>
</compile_context>

<pallas_src>
import functools

import jax
import jax.numpy as jnp
from jax.experimental import pallas as pl
from jax.experimental.pallas import tpu as pltpu


def _bf16_epilogue_default():
    """bf16 VALU exists on v6e/v7x; v5e and older only have f32 VALU."""
    try:
        kind = jax.devices()[0].device_kind.lower()
    except Exception:
        return False
    return ("v6" in kind) or ("v7" in kind)


def mlp_kernel(x_ref, w1_ref, w23_ref, b_ref, o_ref, *, hidden, pad_e,
               bf16_epilogue):
    # Static, lane-aligned slices into the packed weight / bias arrays
    # (hidden and pad_e are multiples of 128, enforced in prep_params).
    w2 = w23_ref[:, 0:hidden]
    w3 = w23_ref[:, hidden:hidden + pad_e]

    b1 = b_ref[:, 0:hidden]
    b2 = b_ref[:, hidden:2 * hidden]
    b3 = b_ref[:, 2 * hidden:2 * hidden + pad_e]

    x = x_ref[...].astype(jnp.bfloat16)

    # fc1 + bias + ReLU  (bf16 matmul, f32 accumulate)
    h1 = jnp.dot(x, w1_ref[...], preferred_element_type=jnp.float32)
    if bf16_epilogue:
        h1 = jnp.maximum(h1.astype(jnp.bfloat16) + b1.astype(jnp.bfloat16),
                         jnp.bfloat16(0.0))
    else:
        h1 = jnp.maximum(h1 + b1, 0.0).astype(jnp.bfloat16)

    # fc2 + bias (no activation, matches the PyTorch forward)
    h2 = jnp.dot(h1, w2, preferred_element_type=jnp.float32)
    if bf16_epilogue:
        h2 = h2.astype(jnp.bfloat16) + b2.astype(jnp.bfloat16)
    else:
        h2 = (h2 + b2).astype(jnp.bfloat16)

    # fc3 -> logits; final bias add kept f32 (only pad_e lanes, negligible)
    logits = jnp.dot(h2, w3, preferred_element_type=jnp.float32) + b3
    o_ref[...] = logits.astype(o_ref.dtype)


def prep_params(params, num_experts=3, pad_e=128, weight_dtype=jnp.bfloat16):
    """One-time prep: pad expert head to 128 lanes, pack fc2/fc3 weights into a
    single HBM array, pack biases into one row, cast weights to bf16.

    Weights are stored (in_dim, out_dim), i.e. transposed vs. nn.Linear.
    Call once; pass the result to mlp_forward for every inference call.
    """
    w1, b1, w2, b2, w3, b3 = params
    d_in, hidden = w1.shape
    assert hidden % 128 == 0, (
        "hidden must be a multiple of 128: in-kernel bias/weight slices at "
        "offsets hidden and 2*hidden must stay lane-aligned")
    assert pad_e % 128 == 0 and pad_e >= num_experts

    w3p = jnp.zeros((hidden, pad_e), w3.dtype).at[:, :num_experts].set(w3)
    b3p = jnp.zeros((pad_e,), b3.dtype).at[:num_experts].set(b3)

    # Pack fc2 + (padded) fc3 weights along lanes -> one weight DMA in-kernel.
    w23 = jnp.concatenate([w2, w3p], axis=1).astype(weight_dtype)
    # Single packed bias row: [b1 | b2 | b3_padded], kept in f32.
    b_packed = jnp.concatenate([b1, b2, b3p]).reshape(1, -1).astype(jnp.float32)

    return (w1.astype(weight_dtype), w23, b_packed)


@functools.partial(jax.jit, static_argnames=("num_experts", "bf16_epilogue"))
def mlp_forward(x, prepped, num_experts=3, bf16_epilogue=None):
    """Hot path: just the pallas_call (+ final cheap slice)."""
    w1, w23, b_packed = prepped
    B, d_in = x.shape
    hidden = w1.shape[1]
    pad_e = w23.shape[1] - hidden
    if bf16_epilogue is None:
        bf16_epilogue = _bf16_epilogue_default()

    kernel = functools.partial(mlp_kernel, hidden=hidden, pad_e=pad_e,
                               bf16_epilogue=bf16_epilogue)
    out_dtype = x.dtype  # bf16 in -> bf16 out; f32 in -> f32 out

    TB_MAX = 512
    if B <= 128:
        # Truly small batch: weight-DMA / launch-overhead bound. Single block,
        # zero grid => minimum per-call overhead.
        full = lambda shape: pl.BlockSpec(shape, lambda: (0,) * len(shape))
        out_padded = pl.pallas_call(
            kernel,
            out_shape=jax.ShapeDtypeStruct((B, pad_e), out_dtype),
            in_specs=[
                full((B, d_in)),
                full(w1.shape),
                full(w23.shape),
                full(b_packed.shape),
            ],
            out_specs=full((B, pad_e)),
        )(x, w1, w23, b_packed)
    else:
        # Mid/large batch: tile rows. At least 2 grid steps so the second
        # TensorCore on v7x gets work; tile capped at 512 rows so per-step
        # overhead (~0.35 us) is well amortized while the live footprint
        # (double-buffered x/out tiles + resident weights + f32 intermediates)
        # stays a few MiB, under v5e's 16 MiB scoped-VMEM default.
        n_tiles = max(2, pl.cdiv(B, TB_MAX))
        TB = pl.cdiv(B, n_tiles)
        TB = ((TB + 7) // 8) * 8  # sublane-align the row tile
        grid = (pl.cdiv(B, TB),)
        out_padded = pl.pallas_call(
            kernel,
            out_shape=jax.ShapeDtypeStruct((B, pad_e), out_dtype),
            grid=grid,
            in_specs=[
                pl.BlockSpec((TB, d_in), lambda i: (i, 0)),
                pl.BlockSpec(w1.shape, lambda i: (0, 0)),
                pl.BlockSpec(w23.shape, lambda i: (0, 0)),
                pl.BlockSpec(b_packed.shape, lambda i: (0, 0)),
            ],
            out_specs=pl.BlockSpec((TB, pad_e), lambda i: (i, 0)),
            compiler_params=pltpu.CompilerParams(
                dimension_semantics=("parallel",)),
        )(x, w1, w23, b_packed)

    return out_padded[:, :num_experts]


def init_params(key, input_dim=128, hidden_dim=512, num_experts=3):
    """Deterministic init mimicking nn.Linear's U(-1/sqrt(fan_in), 1/sqrt(fan_in))."""
    ks = jax.random.split(key, 6)

    def linear(kw, kb, fan_in, fan_out):
        bound = 1.0 / jnp.sqrt(fan_in)
        # stored as (in, out) for the kernel (transposed vs PyTorch)
        w = jax.random.uniform(kw, (fan_in, fan_out), jnp.float32, -bound, bound)
        b = jax.random.uniform(kb, (fan_out,), jnp.float32, -bound, bound)
        return w, b

    w1, b1 = linear(ks[0], ks[1], input_dim, hidden_dim)
    w2, b2 = linear(ks[2], ks[3], hidden_dim, hidden_dim)
    w3, b3 = linear(ks[4], ks[5], hidden_dim, num_experts)
    return (w1, b1, w2, b2, w3, b3)


def mlp_reference(x, params):
    w1, b1, w2, b2, w3, b3 = params
    h = jax.nn.relu(x @ w1 + b1)
    h = h @ w2 + b2
    return h @ w3 + b3


if __name__ == "__main__":
    key = jax.random.PRNGKey(0)
    kx, kx2, kp = jax.random.split(key, 3)

    input_dim, hidden_dim, num_experts = 128, 512, 3

    params = init_params(kp, input_dim, hidden_dim, num_experts)
    # One-time prep (padding, weight/bias packing, bf16 cast) outside hot path.
    prepped = prep_params(params, num_experts=num_experts)
    prepped = jax.tree_util.tree_map(jax.block_until_ready, prepped)

    # Small batch -> zero-grid single-block path.
    batch_small = 8
    x_small = jax.random.normal(kx, (batch_small, input_dim), jnp.float32)
    logits_small = mlp_forward(x_small, prepped, num_experts=num_experts)
    jax.block_until_ready(logits_small)
    ref_small = mlp_reference(x_small, params)
    assert logits_small.shape == (batch_small, num_experts)
    # bf16 weights (+ possible bf16 epilogue) -> looser tolerance vs f32 ref.
    assert jnp.allclose(logits_small, ref_small, atol=1e-1, rtol=1e-1)

    # Ragged mid-size batch -> tiled "parallel" path with a partial last block.
    batch_big = 300
    x_big = jax.random.normal(kx2, (batch_big, input_dim), jnp.float32)
    logits_big = mlp_forward(x_big, prepped, num_experts=num_experts)
    jax.block_until_ready(logits_big)
    ref_big = mlp_reference(x_big, params)
    assert logits_big.shape == (batch_big, num_experts)
    assert jnp.allclose(logits_big, ref_big, atol=1e-1, rtol=1e-1)

    print("KERNEL_OK")
</pallas_src>

<mosaic_0001>
module attributes {stable_mosaic.version = 11 : i64} {
  func.func @mlp_kernel(%arg0: memref<8x128xf32, #tpu.memory_space<vmem>>, %arg1: memref<128x512xbf16, #tpu.memory_space<vmem>>, %arg2: memref<512x640xbf16, #tpu.memory_space<vmem>>, %arg3: memref<1x1152xf32, #tpu.memory_space<vmem>>, %arg4: memref<8x128xf32, #tpu.memory_space<vmem>>) attributes {dimension_semantics = [], scalar_prefetch = 0 : i64, scratch_operands = 0 : i64, tpu.core_type = #tpu.core_type<tc>} {
    %c0 = arith.constant 0 : index
    %c0_0 = arith.constant 0 : index
    %0 = vector.load %arg2[%c0, %c0_0] : memref<512x640xbf16, #tpu.memory_space<vmem>>, vector<512x512xbf16>
    %c0_1 = arith.constant 0 : index
    %c512 = arith.constant 512 : index
    %1 = vector.load %arg2[%c0_1, %c512] : memref<512x640xbf16, #tpu.memory_space<vmem>>, vector<512x128xbf16>
    %c0_2 = arith.constant 0 : index
    %c0_3 = arith.constant 0 : index
    %2 = vector.load %arg3[%c0_2, %c0_3] : memref<1x1152xf32, #tpu.memory_space<vmem>>, vector<1x512xf32>
    %c0_4 = arith.constant 0 : index
    %c512_5 = arith.constant 512 : index
    %3 = vector.load %arg3[%c0_4, %c512_5] : memref<1x1152xf32, #tpu.memory_space<vmem>>, vector<1x512xf32>
    %c0_6 = arith.constant 0 : index
    %c1024 = arith.constant 1024 : index
    %4 = vector.load %arg3[%c0_6, %c1024] : memref<1x1152xf32, #tpu.memory_space<vmem>>, vector<1x128xf32>
    %c0_7 = arith.constant 0 : index
    %c0_8 = arith.constant 0 : index
    %5 = vector.load %arg0[%c0_7, %c0_8] : memref<8x128xf32, #tpu.memory_space<vmem>>, vector<8x128xf32>
    %6 = arith.truncf %5 : vector<8x128xf32> to vector<8x128xbf16>
    %c0_9 = arith.constant 0 : index
    %c0_10 = arith.constant 0 : index
    %7 = vector.load %arg1[%c0_9, %c0_10] : memref<128x512xbf16, #tpu.memory_space<vmem>>, vector<128x512xbf16>
    %cst = arith.constant dense<0.000000e+00> : vector<8x512xf32>
    %8 = tpu.matmul %6, %7, %cst {dimension_numbers = #tpu.dot_dimension_numbers<[1], [0], [0], [1], [0, 0, 1, 1], [], []>} : vector<8x128xbf16>, vector<128x512xbf16>, vector<8x512xf32> -> vector<8x512xf32>
    %9 = vector.broadcast %2 : vector<1x512xf32> to vector<8x512xf32>
    %10 = arith.addf %8, %9 : vector<8x512xf32>
    %cst_11 = arith.constant 0.000000e+00 : f32
    %11 = vector.broadcast %cst_11 : f32 to vector<8x512xf32>
    %12 = arith.maximumf %10, %11 : vector<8x512xf32>
    %13 = arith.truncf %12 : vector<8x512xf32> to vector<8x512xbf16>
    %cst_12 = arith.constant dense<0.000000e+00> : vector<8x512xf32>
    %14 = tpu.matmul %13, %0, %cst_12 {dimension_numbers = #tpu.dot_dimension_numbers<[1], [0], [0], [1], [0, 0, 1, 1], [], []>} : vector<8x512xbf16>, vector<512x512xbf16>, vector<8x512xf32> -> vector<8x512xf32>
    %15 = vector.broadcast %3 : vector<1x512xf32> to vector<8x512xf32>
    %16 = arith.addf %14, %15 : vector<8x512xf32>
    %17 = arith.truncf %16 : vector<8x512xf32> to vector<8x512xbf16>
    %cst_13 = arith.constant dense<0.000000e+00> : vector<8x128xf32>
    %18 = tpu.matmul %17, %1, %cst_13 {dimension_numbers = #tpu.dot_dimension_numbers<[1], [0], [0], [1], [0, 0, 1, 1], [], []>} : vector<8x512xbf16>, vector<512x128xbf16>, vector<8x128xf32> -> vector<8x128xf32>
    %19 = vector.broadcast %4 : vector<1x128xf32> to vector<8x128xf32>
    %20 = arith.addf %18, %19 : vector<8x128xf32>
    %c0_14 = arith.constant 0 : index
    %c0_15 = arith.constant 0 : index
    %21 = vector.load %arg4[%c0_14, %c0_15] : memref<8x128xf32, #tpu.memory_space<vmem>>, vector<8x128xf32>
    tpu.vector_store %arg4[%c0_14, %c0_15], %20 {strides = array<i32>} : memref<8x128xf32, #tpu.memory_space<vmem>>, vector<8x128xf32>,
    return
  }
}

</mosaic_0001>

<bundles_post_ra>
// kernel: mlp_forward.1
= control target key start
LH: loop header
LB: loop body
LE: loop exit
PB: predicated region body
PF: predicated region fallthrough
CT: control target
= control target key end

     0   :  { %9 = vsyncpa [#allocation3], 0  ;;  %s2367_s0 = inlined_call_operand.hbm [shape: f32[8,128], index: 0, kind: input, shape index: {}]   ;;  %s2368_s1 = inlined_call_operand.hbm [shape: bf16[128,512], index: 1, kind: input, shape index: {}]   ;;  %s2369_s2 = inlined_call_operand.hbm [shape: bf16[512,640], index: 2, kind: input, shape index: {}]   ;;  %s2370_s3 = inlined_call_operand.hbm [shape: f32[1,1152], index: 3, kind: input, shape index: {}]   ;;  %s2371_s4 = inlined_call_operand.vmem [shape: f32[8,128], index: 4, kind: output, shape index: {}]  }
   0x1   :  { %10 = vsyncpa [#allocation5], 0 }
   0x2   :  { %11 = vsyncpa [#allocation8], 0  ;;  %s2288_s15 = smov [#allocation4]  }
   0x3   :  { %s27_s16 = sshll.u32 %s2288_s15, 4  ;;  %s28_s16 = int_to_ptr.vmem [resolvable:$true] %s27_s16 }
   0x4   :  { %s2210_s17 = scalar_lea.vmem %s28_s16, 4096  ;;  %p2215_p1 = scmp.lt.s32.totalorder %s28_s16, %s28_s16 }
   0x5   :  { %p2211_p0 = scmp.ne.s32.totalorder %s28_s16, %s2210_s17  ;;  %p2216_p2 = scmp.lt.s32.totalorder %s2210_s17, %s2210_s17 }
   0x7   :  { %p2217_p3 = por %p2216_p2, %p2215_p1 }
   0x9   :  { %p2218_p4 = pnand %p2217_p3, %p2211_p0 }
   0xb   :  { %2221 = shalt.err (!%p2218_p4)
}
   0xc   :  { %s2289_s18 = smov 256   ;;  %s2290_s19 = smov 16  }
   0xd   :  { %33 = dma.hbm_to_vmem [thread:$0]  %s2368_s1, 4096, %s28_s16, [#allocation5], %s2289_s18, %s2289_s18, %s2290_s19  }
   0xe   :  { %s2291_s22 = smov [#allocation2]   ;;  %s2292_s24 = smov [#allocation6]  }
   0xf   :  { %s18_s23 = sshll.u32 %s2291_s22, 4  ;;  %s39_s25 = sshll.u32 %s2292_s24, 4  ;;  %s19_s23 = int_to_ptr.vmem [resolvable:$true] %s18_s23  ;;  %s40_s25 = int_to_ptr.vmem [resolvable:$true] %s39_s25 }
  0x10   :  { %s2230_s26 = scalar_lea.vmem %s19_s23, 128  ;;  %p2235_p6 = scmp.lt.s32.totalorder %s19_s23, %s19_s23 }
  0x11   :  { %p2231_p5 = scmp.ne.s32.totalorder %s19_s23, %s2230_s26  ;;  %p2236_p7 = scmp.lt.s32.totalorder %s2230_s26, %s2230_s26 }
  0x13   :  { %p2237_p8 = por %p2236_p7, %p2235_p6 }
  0x15   :  { %p2238_p9 = pnand %p2237_p8, %p2231_p5 }
  0x17   :  { %2241 = shalt.err (!%p2238_p9)
}
  0x18   :  { %21 = dma.hbm_to_vmem [thread:$0]  %s2367_s0, 128, %s19_s23, [#allocation3]  }
  0x19   :  { %s2250_s29 = scalar_lea.vmem %s40_s25, 20480  ;;  %p2255_p11 = scmp.lt.s32.totalorder %s40_s25, %s40_s25 }
  0x1a   :  { %p2251_p10 = scmp.ne.s32.totalorder %s40_s25, %s2250_s29  ;;  %p2256_p12 = scmp.lt.s32.totalorder %s2250_s29, %s2250_s29 }
  0x1c   :  { %p2257_p13 = por %p2256_p12, %p2255_p11 }
  0x1e   :  { %p2258_p0 = pnand %p2257_p13, %p2251_p10 }
  0x20   :  { %2261 = shalt.err (!%p2258_p0)
}
  0x21   :  { %s2293_s1 = smov 320   ;;  %s2294_s30 = smov 20  }
  0x22   :  { %45 = dma.hbm_to_vmem [thread:$0]  %s2369_s2, 20480, %s40_s25, [#allocation5], %s2293_s1, %s2293_s1, %s2294_s30  }
  0x23   :  { %s2295_s7 = smov [#allocation7]  }
  0x24   :  { %s52_s8 = sshll.u32 %s2295_s7, 4  ;;  %s53_s8 = int_to_ptr.vmem [resolvable:$true] %s52_s8 }
  0x25   :  { %s2270_s9 = scalar_lea.vmem %s53_s8, 144  ;;  %s2274_s0 = scalar_lea.vmem %s53_s8, 160 }
  0x26   :  { %p2271_p1 = scmp.ne.s32.totalorder %s53_s8, %s2270_s9  ;;  %p2275_p2 = scmp.lt.s32.totalorder %s53_s8, %s53_s8 }
  0x27   :  { %p2276_p3 = scmp.lt.s32.totalorder %s2274_s0, %s2270_s9 }
  0x29   :  { %p2277_p4 = por %p2276_p3, %p2275_p2 }
  0x2b   :  { %p2278_p5 = pnand %p2277_p4, %p2271_p1 }
  0x2d   :  { %2281 = shalt.err (!%p2278_p5)
}
  0x2e   :  { %55 = dma.hbm_to_vmem [thread:$0]  %s2370_s3, 144, %s53_s8, [#allocation8]  }
  0x2f   :  { %2282 = dma.done.wait [#allocation3], 128  }
  0x30   :  { %2283 = vsyncadd [#allocation3], 4294967168 }
  0x31   :  { %2284 = dma.done.wait [#allocation5], 24576  }
  0x32   :  { %2285 = vsyncadd [#allocation5], 4294942720 }
  0x33   :  { %2286 = dma.done.wait [#allocation8], 144  }
  0x34   :  { %2287 = vsyncadd [#allocation8], 4294967152  ;;  %v2296_v0 = vmov 0   ;;  %v1930_v1 = vld [vmem:[#allocation4 + $0xe4] ss:$16 sps:$4 sm:$0xff]   ;;  %v264_v33 = vld [vmem:[#allocation2] sm:$0xff] }
  0x35   :  { %511 = vmatprep.mubr.bf16.mxu0 %v2296_v0  ;;  %552 = vmatprep.mubr.bf16.mxu1 %v2296_v0  ;;  %v1932_v2 = vld [vmem:[#allocation4 + $0xec] ss:$16 sps:$4 sm:$0xff]   ;;  %v1934_v3 = vld [vmem:[#allocation4 + $0xe0] ss:$16 sps:$4 sm:$0xff]   ;;  %v1935_v4 = vld [vmem:[#allocation4 + $0xe8] ss:$16 sps:$4 sm:$0xff]   ;;  %v265_v36 = vpack.c.bf16 %v264_v33, %v264_v33 }
  0x36   :  { %479 = vmatprep.subr.bf16.mxu0 %v1930_v1  ;;  %520 = vmatprep.subr.bf16.mxu1 %v1932_v2  ;;  %v1936_v5 = vld [vmem:[#allocation4 + $0xc4] ss:$16 sps:$4 sm:$0xff]   ;;  %v1938_v6 = vld [vmem:[#allocation4 + $0xcc] ss:$16 sps:$4 sm:$0xff]   ;;  %v1940_v7 = vld [vmem:[#allocation4 + $0xc0] ss:$16 sps:$4 sm:$0xff]  }
  0x37   :  { %480 = vmatpush1.bf16.msra.mxu0 %v1934_v3  ;;  %521 = vmatpush1.bf16.msra.mxu1 %v1935_v4  ;;  %v1941_v8 = vld [vmem:[#allocation4 + $0xc8] ss:$16 sps:$4 sm:$0xff]   ;;  %v1942_v9 = vld [vmem:[#allocation4 + $0xa4] ss:$16 sps:$4 sm:$0xff]   ;;  %v1944_v10 = vld [vmem:[#allocation4 + $0xac] ss:$16 sps:$4 sm:$0xff]  }
  0x38   :  { %481 = vmatprep.subr.bf16.mxu0 %v1936_v5  ;;  %522 = vmatprep.subr.bf16.mxu1 %v1938_v6  ;;  %v1946_v11 = vld [vmem:[#allocation4 + $0xa0] ss:$16 sps:$4 sm:$0xff]   ;;  %v1947_v12 = vld [vmem:[#allocation4 + $0xa8] ss:$16 sps:$4 sm:$0xff]   ;;  %v1948_v13 = vld [vmem:[#allocation4 + $0x84] ss:$16 sps:$4 sm:$0xff]  }
  0x39   :  { %v1950_v14 = vld [vmem:[#allocation4 + $0x8c] ss:$16 sps:$4 sm:$0xff]   ;;  %v1952_v15 = vld [vmem:[#allocation4 + $0x80] ss:$16 sps:$4 sm:$0xff]   ;;  %v1953_v16 = vld [vmem:[#allocation4 + $0x88] ss:$16 sps:$4 sm:$0xff]  }
  0x3a   :  { %v1954_v17 = vld [vmem:[#allocation4 + $0x64] ss:$16 sps:$4 sm:$0xff]   ;;  %v1956_v18 = vld [vmem:[#allocation4 + $0x6c] ss:$16 sps:$4 sm:$0xff]   ;;  %v1958_v19 = vld [vmem:[#allocation4 + $0x60] ss:$16 sps:$4 sm:$0xff]  }
  0x3b   :  { %482 = vmatpush1.bf16.msra.mxu0 %v1940_v7  ;;  %523 = vmatpush1.bf16.msra.mxu1 %v1941_v8  ;;  %v1959_v20 = vld [vmem:[#allocation4 + $0x68] ss:$16 sps:$4 sm:$0xff]   ;;  %v1960_v21 = vld [vmem:[#allocation4 + $0x44] ss:$16 sps:$4 sm:$0xff]   ;;  %v1962_v22 = vld [vmem:[#allocation4 + $0x4c] ss:$16 sps:$4 sm:$0xff]  }
  0x3c   :  { %483 = vmatprep.subr.bf16.mxu0 %v1942_v9  ;;  %524 = vmatprep.subr.bf16.mxu1 %v1944_v10  ;;  %v1964_v23 = vld [vmem:[#allocation4 + $0x40] ss:$16 sps:$4 sm:$0xff]   ;;  %v1965_v24 = vld [vmem:[#allocation4 + $0x48] ss:$16 sps:$4 sm:$0xff]   ;;  %v1966_v25 = vld [vmem:[#allocation4 + $0x24] ss:$16 sps:$4 sm:$0xff]  }
  0x3d   :  { %v1968_v26 = vld [vmem:[#allocation4 + $0x2c] ss:$16 sps:$4 sm:$0xff]   ;;  %v1970_v27 = vld [vmem:[#allocation4 + $0x20] ss:$16 sps:$4 sm:$0xff]   ;;  %v1971_v28 = vld [vmem:[#allocation4 + $0x28] ss:$16 sps:$4 sm:$0xff]  }
  0x3e   :  { %v1972_v29 = vld [vmem:[#allocation4 + $0x4] ss:$16 sps:$4 sm:$0xff]   ;;  %v1974_v30 = vld [vmem:[#allocation4 + $0xc] ss:$16 sps:$4 sm:$0xff]   ;;  %v1976_v31 = vld [vmem:[#allocation4] ss:$16 sps:$4 sm:$0xff]  }
  0x3f   :  { %484 = vmatpush1.bf16.msra.mxu0 %v1946_v11  ;;  %525 = vmatpush1.bf16.msra.mxu1 %v1947_v12  ;;  %v1977_v32 = vld [vmem:[#allocation4 + $0x8] ss:$16 sps:$4 sm:$0xff]   ;;  %v1980_v34 = vld [vmem:[#allocation6 + $0x11c] ss:$20 sps:$4 sm:$0xff]   ;;  %v1992_v43 = vld [vmem:[#allocation6 + $0xcc] ss:$20 sps:$4 sm:$0xff]  }
  0x40   :  { %485 = vmatprep.subr.bf16.mxu0 %v1948_v13  ;;  %526 = vmatprep.subr.bf16.mxu1 %v1950_v14  ;;  %v1983_v35 = vld [vmem:[#allocation6 + $0x39c] ss:$20 sps:$4 sm:$0xff]   ;;  %v1978_v37 = vld [vmem:[#allocation6 + $0x118] ss:$20 sps:$4 sm:$0xff]   ;;  %v1986_v39 = vld [vmem:[#allocation6 + $0xf4] ss:$20 sps:$4 sm:$0xff]  }
  0x41   :  { %v1981_v38 = vld [vmem:[#allocation6 + $0x398] ss:$20 sps:$4 sm:$0xff]   ;;  %v1989_v40 = vld [vmem:[#allocation6 + $0x374] ss:$20 sps:$4 sm:$0xff]   ;;  %v1984_v41 = vld [vmem:[#allocation6 + $0xf0] ss:$20 sps:$4 sm:$0xff]  }
  0x42   :  { %v1987_v42 = vld [vmem:[#allocation6 + $0x370] ss:$20 sps:$4 sm:$0xff]   ;;  %v1995_v44 = vld [vmem:[#allocation6 + $0x34c] ss:$20 sps:$4 sm:$0xff]   ;;  %v1990_v45 = vld [vmem:[#allocation6 + $0xc8] ss:$20 sps:$4 sm:$0xff]  }
  0x43   :  { %486 = vmatpush1.bf16.msra.mxu0 %v1952_v15  ;;  %527 = vmatpush1.bf16.msra.mxu1 %v1953_v16  ;;  %v1993_v46 = vld [vmem:[#allocation6 + $0x348] ss:$20 sps:$4 sm:$0xff]   ;;  %v1998_v47 = vld [vmem:[#allocation6 + $0xa4] ss:$20 sps:$4 sm:$0xff]   ;;  %v1996_v49 = vld [vmem:[#allocation6 + $0xa0] ss:$20 sps:$4 sm:$0xff]  }
  0x44   :  { %487 = vmatprep.subr.bf16.mxu0 %v1954_v17  ;;  %528 = vmatprep.subr.bf16.mxu1 %v1956_v18  ;;  %v2001_v48 = vld [vmem:[#allocation6 + $0x324] ss:$20 sps:$4 sm:$0xff]   ;;  %v1999_v50 = vld [vmem:[#allocation6 + $0x320] ss:$20 sps:$4 sm:$0xff]   ;;  %v2004_v51 = vld [vmem:[#allocation6 + $0x7c] ss:$20 sps:$4 sm:$0xff]  }
  0x45   :  { %v2007_v52 = vld [vmem:[#allocation6 + $0x2fc] ss:$20 sps:$4 sm:$0xff]   ;;  %v2002_v53 = vld [vmem:[#allocation6 + $0x78] ss:$20 sps:$4 sm:$0xff]   ;;  %v2010_v55 = vld [vmem:[#allocation6 + $0x54] ss:$20 sps:$4 sm:$0xff]  }
  0x46   :  { %v2005_v54 = vld [vmem:[#allocation6 + $0x2f8] ss:$20 sps:$4 sm:$0xff]   ;;  %v2013_v56 = vld [vmem:[#allocation6 + $0x2d4] ss:$20 sps:$4 sm:$0xff]   ;;  %v2008_v57 = vld [vmem:[#allocation6 + $0x50] ss:$20 sps:$4 sm:$0xff]  }
  0x47   :  { %488 = vmatpush1.bf16.msra.mxu0 %v1958_v19  ;;  %529 = vmatpush1.bf16.msra.mxu1 %v1959_v20  ;;  %v2011_v58 = vld [vmem:[#allocation6 + $0x2d0] ss:$20 sps:$4 sm:$0xff]   ;;  %v2016_v59 = vld [vmem:[#allocation6 + $0x2c] ss:$20 sps:$4 sm:$0xff]   ;;  %v2014_v61 = vld [vmem:[#allocation6 + $0x28] ss:$20 sps:$4 sm:$0xff]  }
  0x48   :  { %489 = vmatprep.subr.bf16.mxu0 %v1960_v21  ;;  %530 = vmatprep.subr.bf16.mxu1 %v1962_v22  ;;  %v2019_v60 = vld [vmem:[#allocation6 + $0x2ac] ss:$20 sps:$4 sm:$0xff]   ;;  %v2017_v62 = vld [vmem:[#allocation6 + $0x2a8] ss:$20 sps:$4 sm:$0xff]   ;;  %v2022_v63 = vld [vmem:[#allocation6 + $0x4] ss:$20 sps:$4 sm:$0xff]  }
  0x49   :  { %v2025_v0 = vld [vmem:[#allocation6 + $0x284] ss:$20 sps:$4 sm:$0xff]   ;;  %v2020_v1 = vld [vmem:[#allocation6] ss:$20 sps:$4 sm:$0xff]   ;;  %v2028_v3 = vld [vmem:[#allocation6 + $0x25c] ss:$20 sps:$4 sm:$0xff]  }
  0x4a   :  { %v2023_v2 = vld [vmem:[#allocation6 + $0x280] ss:$20 sps:$4 sm:$0xff]   ;;  %v2031_v4 = vld [vmem:[#allocation6 + $0x4dc] ss:$20 sps:$4 sm:$0xff]   ;;  %v2026_v5 = vld [vmem:[#allocation6 + $0x258] ss:$20 sps:$4 sm:$0xff]  }
  0x4b   :  { %490 = vmatpush1.bf16.msra.mxu0 %v1964_v23  ;;  %531 = vmatpush1.bf16.msra.mxu1 %v1965_v24  ;;  %v2029_v6 = vld [vmem:[#allocation6 + $0x4d8] ss:$20 sps:$4 sm:$0xff]   ;;  %v2034_v7 = vld [vmem:[#allocation6 + $0x234] ss:$20 sps:$4 sm:$0xff]   ;;  %v2032_v9 = vld [vmem:[#allocation6 + $0x230] ss:$20 sps:$4 sm:$0xff]  }
  0x4c   :  { %491 = vmatprep.subr.bf16.mxu0 %v1966_v25  ;;  %532 = vmatprep.subr.bf16.mxu1 %v1968_v26  ;;  %v2037_v8 = vld [vmem:[#allocation6 + $0x4b4] ss:$20 sps:$4 sm:$0xff]   ;;  %v2035_v10 = vld [vmem:[#allocation6 + $0x4b0] ss:$20 sps:$4 sm:$0xff]   ;;  %v2040_v11 = vld [vmem:[#allocation6 + $0x20c] ss:$20 sps:$4 sm:$0xff]  }
  0x4d   :  { %v2043_v12 = vld [vmem:[#allocation6 + $0x48c] ss:$20 sps:$4 sm:$0xff]   ;;  %v2038_v13 = vld [vmem:[#allocation6 + $0x208] ss:$20 sps:$4 sm:$0xff]   ;;  %v2046_v15 = vld [vmem:[#allocation6 + $0x1e4] ss:$20 sps:$4 sm:$0xff]  }
  0x4e   :  { %v2041_v14 = vld [vmem:[#allocation6 + $0x488] ss:$20 sps:$4 sm:$0xff]   ;;  %v2049_v16 = vld [vmem:[#allocation6 + $0x464] ss:$20 sps:$4 sm:$0xff]   ;;  %v2044_v17 = vld [vmem:[#allocation6 + $0x1e0] ss:$20 sps:$4 sm:$0xff]  }
  0x4f   :  { %492 = vmatpush1.bf16.msra.mxu0 %v1970_v27  ;;  %533 = vmatpush1.bf16.msra.mxu1 %v1971_v28  ;;  %v2047_v18 = vld [vmem:[#allocation6 + $0x460] ss:$20 sps:$4 sm:$0xff]   ;;  %v2052_v19 = vld [vmem:[#allocation6 + $0x1bc] ss:$20 sps:$4 sm:$0xff]   ;;  %v2050_v21 = vld [vmem:[#allocation6 + $0x1b8] ss:$20 sps:$4 sm:$0xff]  }
  0x50   :  { %493 = vmatprep.subr.bf16.mxu0 %v1972_v29  ;;  %534 = vmatprep.subr.bf16.mxu1 %v1974_v30  ;;  %v2055_v20 = vld [vmem:[#allocation6 + $0x43c] ss:$20 sps:$4 sm:$0xff]   ;;  %v2053_v22 = vld [vmem:[#allocation6 + $0x438] ss:$20 sps:$4 sm:$0xff]   ;;  %v2058_v23 = vld [vmem:[#allocation6 + $0x194] ss:$20 sps:$4 sm:$0xff]  }
  0x51   :  { %v2061_v24 = vld [vmem:[#allocation6 + $0x414] ss:$20 sps:$4 sm:$0xff]   ;;  %v2056_v25 = vld [vmem:[#allocation6 + $0x190] ss:$20 sps:$4 sm:$0xff]   ;;  %v2064_v27 = vld [vmem:[#allocation6 + $0x16c] ss:$20 sps:$4 sm:$0xff]  }
  0x52   :  { %v2059_v26 = vld [vmem:[#allocation6 + $0x410] ss:$20 sps:$4 sm:$0xff]   ;;  %v2067_v28 = vld [vmem:[#allocation6 + $0x3ec] ss:$20 sps:$4 sm:$0xff]   ;;  %v2062_v29 = vld [vmem:[#allocation6 + $0x168] ss:$20 sps:$4 sm:$0xff]  }
  0x53   :  { %494 = vmatpush1.bf16.msra.mxu0 %v1976_v31  ;;  %535 = vmatpush1.bf16.msra.mxu1 %v1977_v32  ;;  %v2065_v30 = vld [vmem:[#allocation6 + $0x3e8] ss:$20 sps:$4 sm:$0xff]   ;;  %v2070_v31 = vld [vmem:[#allocation6 + $0x144] ss:$20 sps:$4 sm:$0xff]   ;;  %v2068_v33 = vld [vmem:[#allocation6 + $0x140] ss:$20 sps:$4 sm:$0xff]  }
  0x54   :  { %1230 = vmatprep.subr.bf16.mxu0 %v1980_v34  ;;  %1271 = vmatprep.subr.bf16.mxu1 %v1983_v35  ;;  %v2073_v32 = vld [vmem:[#allocation6 + $0x3c4] ss:$20 sps:$4 sm:$0xff]   ;;  %v2071_v34 = vld [vmem:[#allocation6 + $0x3c0] ss:$20 sps:$4 sm:$0xff]  }
  0x55   :  { %v2076_v35 = vld [vmem:[#allocation6 + $0x124] ss:$20 sps:$4 sm:$0xff]  }
  0x56   :  { %512 = vmatmul.mubr.bf16.vlgmr.msra.gmra.mxu0 %v265_v36  ;;  %553 = vmatmul.mubr.bf16.vlgmr.msra.gmra.mxu1 %v265_v36  ;;  %v2079_v36 = vld [vmem:[#allocation6 + $0x3a4] ss:$20 sps:$4 sm:$0xff]  }
  0x57   :  { %1231 = vmatpush1.bf16.msra.mxu0 %v1978_v37  ;;  %1272 = vmatpush1.bf16.msra.mxu1 %v1981_v38  ;;  %v299_v37 = vlaneseq }
  0x58   :  { %1232 = vmatprep.subr.bf16.mxu0 %v1986_v39  ;;  %1273 = vmatprep.subr.bf16.mxu1 %v1989_v40 }
  0x59   :  { %v2334_v38 = vshrl.u32 %v299_v37, 7  ;;  %v2125_v37 = vld [vmem:[#allocation6 + $0x4e0] ss:$20 sps:$4 sm:$0xff]  }
  0x5b   :  { %1233 = vmatpush1.bf16.msra.mxu0 %v1984_v41  ;;  %1274 = vmatpush1.bf16.msra.mxu1 %v1987_v42  ;;  %v301_v39 = vsub.s32 0, %v2334_v38  ;;  %v309_v40 = vsub.s32 2, %v2334_v38  ;;  %v261_v41 = vld [vmem:[#allocation7] sm:$0xf]  ;;  %v305_v42 = vsub.s32 1, %v2334_v38 }
  0x5c   :  { %1234 = vmatprep.subr.bf16.mxu0 %v1992_v43  ;;  %1275 = vmatprep.subr.bf16.mxu1 %v1995_v44  ;;  %v313_v43 = vsub.s32 3, %v2334_v38 }
  0x5d   :  { %v302_v44 = vrot.slane %v261_v41, %v301_v39 }
  0x5f   :  { %1235 = vmatpush1.bf16.msra.mxu0 %v1990_v45  ;;  %1276 = vmatpush1.bf16.msra.mxu1 %v1993_v46  ;;  %v310_v45 = vrot.slane %v261_v41, %v309_v40  ;;  %v306_v46 = vrot.slane %v261_v41, %v305_v42 }
  0x60   :  { %1236 = vmatprep.subr.bf16.mxu0 %v1998_v47  ;;  %1277 = vmatprep.subr.bf16.mxu1 %v2001_v48  ;;  %v314_v47 = vrot.slane %v261_v41, %v313_v43  ;;  %v2130_v41 = vld [vmem:[#allocation6 + $0x23c] ss:$20 sps:$4 sm:$0xff]  }
  0x63   :  { %1237 = vmatpush1.bf16.msra.mxu0 %v1996_v49  ;;  %1278 = vmatpush1.bf16.msra.mxu1 %v1999_v50 }
  0x64   :  { %1238 = vmatprep.subr.bf16.mxu0 %v2004_v51  ;;  %1279 = vmatprep.subr.bf16.mxu1 %v2007_v52 }
  0x67   :  { %1239 = vmatpush1.bf16.msra.mxu0 %v2002_v53  ;;  %1280 = vmatpush1.bf16.msra.mxu1 %v2005_v54 }
  0x68   :  { %1240 = vmatprep.subr.bf16.mxu0 %v2010_v55  ;;  %1281 = vmatprep.subr.bf16.mxu1 %v2013_v56 }
  0x6b   :  { %1241 = vmatpush1.bf16.msra.mxu0 %v2008_v57  ;;  %1282 = vmatpush1.bf16.msra.mxu1 %v2011_v58 }
  0x6c   :  { %1242 = vmatprep.subr.bf16.mxu0 %v2016_v59  ;;  %1283 = vmatprep.subr.bf16.mxu1 %v2019_v60 }
  0x6f   :  { %1243 = vmatpush1.bf16.msra.mxu0 %v2014_v61  ;;  %1284 = vmatpush1.bf16.msra.mxu1 %v2017_v62 }
  0x70   :  { %1244 = vmatprep.subr.bf16.mxu0 %v2022_v63  ;;  %1285 = vmatprep.subr.bf16.mxu1 %v2025_v0 }
  0x73   :  { %1245 = vmatpush1.bf16.msra.mxu0 %v2020_v1  ;;  %1286 = vmatpush1.bf16.msra.mxu1 %v2023_v2 }
  0x74   :  { %1246 = vmatprep.subr.bf16.mxu0 %v2028_v3  ;;  %1287 = vmatprep.subr.bf16.mxu1 %v2031_v4  ;;  %v2074_v3 = vld [vmem:[#allocation6 + $0x120] ss:$20 sps:$4 sm:$0xff]  }
  0x75   :  { %v2077_v4 = vld [vmem:[#allocation6 + $0x3a0] ss:$20 sps:$4 sm:$0xff]  }
  0x77   :  { %1247 = vmatpush2.bf16.msra.mxu0 %v2026_v5  ;;  %1288 = vmatpush2.bf16.msra.mxu1 %v2029_v6  ;;  %v2082_v6 = vld [vmem:[#allocation6 + $0xfc] ss:$20 sps:$4 sm:$0xff]  }
  0x78   :  { %1248 = vmatprep.subr.bf16.mxu0 %v2034_v7  ;;  %1289 = vmatprep.subr.bf16.mxu1 %v2037_v8  ;;  %v2085_v7 = vld [vmem:[#allocation6 + $0x37c] ss:$20 sps:$4 sm:$0xff]   ;;  %v2080_v8 = vld [vmem:[#allocation6 + $0xf8] ss:$20 sps:$4 sm:$0xff]  }
  0x7b   :  { %1249 = vmatpush2.bf16.msra.mxu0 %v2032_v9  ;;  %1290 = vmatpush2.bf16.msra.mxu1 %v2035_v10  ;;  %v2083_v9 = vld [vmem:[#allocation6 + $0x378] ss:$20 sps:$4 sm:$0xff]   ;;  %v2088_v10 = vld [vmem:[#allocation6 + $0xd4] ss:$20 sps:$4 sm:$0xff]  }
  0x7c   :  { %1250 = vmatprep.subr.bf16.mxu0 %v2040_v11  ;;  %1291 = vmatprep.subr.bf16.mxu1 %v2043_v12  ;;  %v2091_v11 = vld [vmem:[#allocation6 + $0x354] ss:$20 sps:$4 sm:$0xff]   ;;  %v2086_v12 = vld [vmem:[#allocation6 + $0xd0] ss:$20 sps:$4 sm:$0xff]  }
  0x7f   :  { %1251 = vmatpush2.bf16.msra.mxu0 %v2038_v13  ;;  %1292 = vmatpush2.bf16.msra.mxu1 %v2041_v14  ;;  %v2089_v13 = vld [vmem:[#allocation6 + $0x350] ss:$20 sps:$4 sm:$0xff]   ;;  %v2094_v14 = vld [vmem:[#allocation6 + $0xac] ss:$20 sps:$4 sm:$0xff]  }
  0x80   :  { %1252 = vmatprep.subr.bf16.mxu0 %v2046_v15  ;;  %1293 = vmatprep.subr.bf16.mxu1 %v2049_v16  ;;  %v2097_v15 = vld [vmem:[#allocation6 + $0x32c] ss:$20 sps:$4 sm:$0xff]   ;;  %v2092_v16 = vld [vmem:[#allocation6 + $0xa8] ss:$20 sps:$4 sm:$0xff]  }
  0x83   :  { %1253 = vmatpush2.bf16.msra.mxu0 %v2044_v17  ;;  %1294 = vmatpush2.bf16.msra.mxu1 %v2047_v18  ;;  %v2095_v17 = vld [vmem:[#allocation6 + $0x328] ss:$20 sps:$4 sm:$0xff]   ;;  %v2100_v18 = vld [vmem:[#allocation6 + $0x84] ss:$20 sps:$4 sm:$0xff]  }
  0x84   :  { %1254 = vmatprep.subr.bf16.mxu0 %v2052_v19  ;;  %1295 = vmatprep.subr.bf16.mxu1 %v2055_v20  ;;  %v2103_v19 = vld [vmem:[#allocation6 + $0x304] ss:$20 sps:$4 sm:$0xff]   ;;  %v2098_v20 = vld [vmem:[#allocation6 + $0x80] ss:$20 sps:$4 sm:$0xff]  }
  0x87   :  { %1255 = vmatpush2.bf16.msra.mxu0 %v2050_v21  ;;  %1296 = vmatpush2.bf16.msra.mxu1 %v2053_v22  ;;  %v2101_v21 = vld [vmem:[#allocation6 + $0x300] ss:$20 sps:$4 sm:$0xff]   ;;  %v2106_v22 = vld [vmem:[#allocation6 + $0x5c] ss:$20 sps:$4 sm:$0xff]  }
  0x88   :  { %1256 = vmatprep.subr.bf16.mxu0 %v2058_v23  ;;  %1297 = vmatprep.subr.bf16.mxu1 %v2061_v24  ;;  %v2109_v23 = vld [vmem:[#allocation6 + $0x2dc] ss:$20 sps:$4 sm:$0xff]   ;;  %v2104_v24 = vld [vmem:[#allocation6 + $0x58] ss:$20 sps:$4 sm:$0xff]  }
  0x8b   :  { %1257 = vmatpush2.bf16.msra.mxu0 %v2056_v25  ;;  %1298 = vmatpush2.bf16.msra.mxu1 %v2059_v26  ;;  %v2107_v25 = vld [vmem:[#allocation6 + $0x2d8] ss:$20 sps:$4 sm:$0xff]   ;;  %v2112_v26 = vld [vmem:[#allocation6 + $0x34] ss:$20 sps:$4 sm:$0xff]  }
  0x8c   :  { %1258 = vmatprep.subr.bf16.mxu0 %v2064_v27  ;;  %1299 = vmatprep.subr.bf16.mxu1 %v2067_v28  ;;  %v2115_v27 = vld [vmem:[#allocation6 + $0x2b4] ss:$20 sps:$4 sm:$0xff]   ;;  %v2110_v28 = vld [vmem:[#allocation6 + $0x30] ss:$20 sps:$4 sm:$0xff]  }
  0x8f   :  { %1259 = vmatpush2.bf16.msra.mxu0 %v2062_v29  ;;  %1300 = vmatpush2.bf16.msra.mxu1 %v2065_v30  ;;  %v2113_v29 = vld [vmem:[#allocation6 + $0x2b0] ss:$20 sps:$4 sm:$0xff]   ;;  %v2118_v30 = vld [vmem:[#allocation6 + $0xc] ss:$20 sps:$4 sm:$0xff]  }
  0x90   :  { %1260 = vmatprep.subr.bf16.mxu0 %v2070_v31  ;;  %1301 = vmatprep.subr.bf16.mxu1 %v2073_v32  ;;  %v2121_v31 = vld [vmem:[#allocation6 + $0x28c] ss:$20 sps:$4 sm:$0xff]   ;;  %v2116_v32 = vld [vmem:[#allocation6 + $0x8] ss:$20 sps:$4 sm:$0xff]  }
  0x93   :  { %1261 = vmatpush2.bf16.msra.mxu0 %v2068_v33  ;;  %1302 = vmatpush2.bf16.msra.mxu1 %v2071_v34  ;;  %v2119_v33 = vld [vmem:[#allocation6 + $0x288] ss:$20 sps:$4 sm:$0xff]   ;;  %v2124_v34 = vld [vmem:[#allocation6 + $0x264] ss:$20 sps:$4 sm:$0xff]  }
  0x94   :  { %1312 = vmatprep.subr.bf16.mxu0 %v2076_v35  ;;  %1353 = vmatprep.subr.bf16.mxu1 %v2079_v36  ;;  %v2127_v35 = vld [vmem:[#allocation6 + $0x4e4] ss:$20 sps:$4 sm:$0xff]   ;;  %v2122_v36 = vld [vmem:[#allocation6 + $0x260] ss:$20 sps:$4 sm:$0xff]  }
 0x116   :  { %v513_v48 = vpop.f32.mrf.mxu0  ;;  %v554_v49 = vpop.f32.mrf.mxu1 }
 0x117   :  { %v514_v50 = vadd.f32 %v513_v48, %v302_v44  ;;  %v555_v51 = vadd.f32 %v554_v49, %v310_v45  ;;  %v2133_v44 = vld [vmem:[#allocation6 + $0x4bc] ss:$20 sps:$4 sm:$0xff]   ;;  %v2128_v45 = vld [vmem:[#allocation6 + $0x238] ss:$20 sps:$4 sm:$0xff]   ;;  %v2139_v48 = vld [vmem:[#allocation6 + $0x494] ss:$20 sps:$4 sm:$0xff]  }
 0x118   :  { %v515_v52 = vpop.f32.mrf.mxu0  ;;  %v556_v53 = vpop.f32.mrf.mxu1  ;;  %v2134_v49 = vld [vmem:[#allocation6 + $0x210] ss:$20 sps:$4 sm:$0xff]  }
 0x119   :  { %v563_v54 = vmax.f32 %v555_v51, 0.0  ;;  %v516_v55 = vadd.f32 %v515_v52, %v306_v46  ;;  %v557_v56 = vadd.f32 %v556_v53, %v314_v47  ;;  %v561_v57 = vmax.f32 %v514_v50, 0.0  ;;  %v2131_v46 = vld [vmem:[#allocation6 + $0x4b8] ss:$20 sps:$4 sm:$0xff]   ;;  %v2136_v47 = vld [vmem:[#allocation6 + $0x214] ss:$20 sps:$4 sm:$0xff]  }
 0x11a   :  { %v517_v58 = vpop.f32.mrf.mxu0  ;;  %v558_v59 = vpop.f32.mrf.mxu1  ;;  %v2137_v50 = vld [vmem:[#allocation6 + $0x490] ss:$20 sps:$4 sm:$0xff]   ;;  %v2142_v51 = vld [vmem:[#allocation6 + $0x1ec] ss:$20 sps:$4 sm:$0xff]   ;;  %v2140_v53 = vld [vmem:[#allocation6 + $0x1e8] ss:$20 sps:$4 sm:$0xff]  }
 0x11b   :  { %v562_v60 = vmax.f32 %v516_v55, 0.0  ;;  %v564_v61 = vmax.f32 %v557_v56, 0.0  ;;  %v2348_v62 = vpack.c.bf16 %v563_v54, %v563_v54  ;;  %v2350_v5 = vpack.c.bf16 %v561_v57, %v561_v57  ;;  %v2145_v52 = vld [vmem:[#allocation6 + $0x46c] ss:$20 sps:$4 sm:$0xff]   ;;  %v2143_v54 = vld [vmem:[#allocation6 + $0x468] ss:$20 sps:$4 sm:$0xff]  }
 0x11c   :  { %v518_v63 = vpop.f32.mrf.mxu0  ;;  %v559_v0 = vpop.f32.mrf.mxu1  ;;  %v2148_v55 = vld [vmem:[#allocation6 + $0x1c4] ss:$20 sps:$4 sm:$0xff]   ;;  %v2146_v57 = vld [vmem:[#allocation6 + $0x1c0] ss:$20 sps:$4 sm:$0xff]   ;;  %v2154_v59 = vld [vmem:[#allocation6 + $0x19c] ss:$20 sps:$4 sm:$0xff]  }
 0x11d   :  { %v566_v1 = vpack.c.bf16 %v562_v60, %v562_v60  ;;  %v568_v2 = vpack.c.bf16 %v564_v61, %v564_v61  ;;  %v2151_v56 = vld [vmem:[#allocation6 + $0x444] ss:$20 sps:$4 sm:$0xff]   ;;  %v2149_v58 = vld [vmem:[#allocation6 + $0x440] ss:$20 sps:$4 sm:$0xff]   ;;  %v2157_v60 = vld [vmem:[#allocation6 + $0x41c] ss:$20 sps:$4 sm:$0xff]  }
 0x11e   :  { %v2152_v61 = vld [vmem:[#allocation6 + $0x198] ss:$20 sps:$4 sm:$0xff]   ;;  %v2160_v0 = vld [vmem:[#allocation6 + $0x174] ss:$20 sps:$4 sm:$0xff]  }
 0x11f   :  { %1262 = vmatprep.mubr.bf16.mxu0 %v566_v1  ;;  %1303 = vmatprep.mubr.bf16.mxu1 %v568_v2  ;;  %v2155_v63 = vld [vmem:[#allocation6 + $0x418] ss:$20 sps:$4 sm:$0xff]  }
 0x120   :  { %1263 = vmatmul.mubr.bf16.vlgmr.msra.gmra.mxu0 %v2350_v5  ;;  %1304 = vmatmul.mubr.bf16.vlgmr.msra.gmra.mxu1 %v2348_v62 }
 0x121   :  { %1313 = vmatpush1.bf16.msra.mxu0 %v2074_v3  ;;  %1354 = vmatpush1.bf16.msra.mxu1 %v2077_v4  ;;  %v2161_v3 = vld [vmem:[#allocation6 + $0x3f0] ss:$20 sps:$4 sm:$0xff]   ;;  %v2166_v4 = vld [vmem:[#allocation6 + $0x14c] ss:$20 sps:$4 sm:$0xff]  }
 0x122   :  { %1344 = vmatprep.mubr.bf16.mxu0 %v566_v1  ;;  %1385 = vmatprep.mubr.bf16.mxu1 %v568_v2  ;;  %v2163_v1 = vld [vmem:[#allocation6 + $0x3f4] ss:$20 sps:$4 sm:$0xff]   ;;  %v2158_v2 = vld [vmem:[#allocation6 + $0x170] ss:$20 sps:$4 sm:$0xff]  }
 0x123   :  { %1314 = vmatprep.subr.bf16.mxu0 %v2082_v6  ;;  %1355 = vmatprep.subr.bf16.mxu1 %v2085_v7  ;;  %v2169_v6 = vld [vmem:[#allocation6 + $0x3cc] ss:$20 sps:$4 sm:$0xff]   ;;  %v2164_v7 = vld [vmem:[#allocation6 + $0x148] ss:$20 sps:$4 sm:$0xff]  }
 0x125   :  { %1315 = vmatpush1.bf16.msra.mxu0 %v2080_v8  ;;  %1356 = vmatpush1.bf16.msra.mxu1 %v2083_v9  ;;  %v2167_v8 = vld [vmem:[#allocation6 + $0x3c8] ss:$20 sps:$4 sm:$0xff]  }
 0x126   :  { %1316 = vmatprep.subr.bf16.mxu0 %v2088_v10  ;;  %1357 = vmatprep.subr.bf16.mxu1 %v2091_v11  ;;  %v2170_v9 = vld [vmem:[#allocation6 + $0x268] ss:$20 sps:$4 sm:$0xff]   ;;  %v2172_v11 = vld [vmem:[#allocation6 + $0x240] ss:$20 sps:$4 sm:$0xff]  }
 0x127   :  { %v2171_v10 = vld [vmem:[#allocation6 + $0x128] ss:$20 sps:$4 sm:$0xff]  }
 0x129   :  { %1317 = vmatpush1.bf16.msra.mxu0 %v2086_v12  ;;  %1358 = vmatpush1.bf16.msra.mxu1 %v2089_v13  ;;  %v2173_v12 = vld [vmem:[#allocation6 + $0x100] ss:$20 sps:$4 sm:$0xff]   ;;  %v2174_v13 = vld [vmem:[#allocation6 + $0x218] ss:$20 sps:$4 sm:$0xff]  }
 0x12a   :  { %1318 = vmatprep.subr.bf16.mxu0 %v2094_v14  ;;  %1359 = vmatprep.subr.bf16.mxu1 %v2097_v15  ;;  %v2175_v14 = vld [vmem:[#allocation6 + $0xd8] ss:$20 sps:$4 sm:$0xff]   ;;  %v2176_v15 = vld [vmem:[#allocation6 + $0x1f0] ss:$20 sps:$4 sm:$0xff]  }
 0x12d   :  { %1319 = vmatpush1.bf16.msra.mxu0 %v2092_v16  ;;  %1360 = vmatpush1.bf16.msra.mxu1 %v2095_v17  ;;  %v2177_v16 = vld [vmem:[#allocation6 + $0xb0] ss:$20 sps:$4 sm:$0xff]   ;;  %v2178_v17 = vld [vmem:[#allocation6 + $0x1c8] ss:$20 sps:$4 sm:$0xff]  }
 0x12e   :  { %1320 = vmatprep.subr.bf16.mxu0 %v2100_v18  ;;  %1361 = vmatprep.subr.bf16.mxu1 %v2103_v19  ;;  %v2186_v18 = vld [vmem:[#allocation6 + $0x4e8] ss:$20 sps:$4 sm:$0xff]  }
 0x12f   :  { %v2187_v19 = vld [vmem:[#allocation6 + $0x3a8] ss:$20 sps:$4 sm:$0xff]  }
 0x131   :  { %1321 = vmatpush1.bf16.msra.mxu0 %v2098_v20  ;;  %1362 = vmatpush1.bf16.msra.mxu1 %v2101_v21  ;;  %v2188_v20 = vld [vmem:[#allocation6 + $0x4c0] ss:$20 sps:$4 sm:$0xff]  }
 0x132   :  { %1322 = vmatprep.subr.bf16.mxu0 %v2106_v22  ;;  %1363 = vmatprep.subr.bf16.mxu1 %v2109_v23  ;;  %v2180_v21 = vld [vmem:[#allocation6 + $0x1a0] ss:$20 sps:$4 sm:$0xff]   ;;  %v2190_v22 = vld [vmem:[#allocation6 + $0x498] ss:$20 sps:$4 sm:$0xff]  }
 0x133   :  { %v2181_v23 = vld [vmem:[#allocation6 + $0x60] ss:$20 sps:$4 sm:$0xff]  }
 0x135   :  { %1323 = vmatpush1.bf16.msra.mxu0 %v2104_v24  ;;  %1364 = vmatpush1.bf16.msra.mxu1 %v2107_v25  ;;  %v2191_v24 = vld [vmem:[#allocation6 + $0x358] ss:$20 sps:$4 sm:$0xff]  }
 0x136   :  { %1324 = vmatprep.subr.bf16.mxu0 %v2112_v26  ;;  %1365 = vmatprep.subr.bf16.mxu1 %v2115_v27  ;;  %v2182_v25 = vld [vmem:[#allocation6 + $0x178] ss:$20 sps:$4 sm:$0xff]   ;;  %v2192_v26 = vld [vmem:[#allocation6 + $0x470] ss:$20 sps:$4 sm:$0xff]  }
 0x137   :  { %v2183_v27 = vld [vmem:[#allocation6 + $0x38] ss:$20 sps:$4 sm:$0xff]  }
 0x139   :  { %1325 = vmatpush1.bf16.msra.mxu0 %v2110_v28  ;;  %1366 = vmatpush1.bf16.msra.mxu1 %v2113_v29  ;;  %v2193_v28 = vld [vmem:[#allocation6 + $0x330] ss:$20 sps:$4 sm:$0xff]  }
 0x13a   :  { %1326 = vmatprep.subr.bf16.mxu0 %v2118_v30  ;;  %1367 = vmatprep.subr.bf16.mxu1 %v2121_v31  ;;  %v2184_v29 = vld [vmem:[#allocation6 + $0x150] ss:$20 sps:$4 sm:$0xff]   ;;  %v2194_v30 = vld [vmem:[#allocation6 + $0x448] ss:$20 sps:$4 sm:$0xff]  }
 0x13b   :  { %v2185_v31 = vld [vmem:[#allocation6 + $0x10] ss:$20 sps:$4 sm:$0xff]  }
 0x13d   :  { %1327 = vmatpush1.bf16.msra.mxu0 %v2116_v32  ;;  %1368 = vmatpush1.bf16.msra.mxu1 %v2119_v33  ;;  %v2195_v32 = vld [vmem:[#allocation6 + $0x308] ss:$20 sps:$4 sm:$0xff]   ;;  %v2196_v33 = vld [vmem:[#allocation6 + $0x420] ss:$20 sps:$4 sm:$0xff]  }
 0x13e   :  { %1328 = vmatprep.subr.bf16.mxu0 %v2124_v34  ;;  %1369 = vmatprep.subr.bf16.mxu1 %v2127_v35  ;;  %v2197_v34 = vld [vmem:[#allocation6 + $0x2e0] ss:$20 sps:$4 sm:$0xff]   ;;  %v2198_v35 = vld [vmem:[#allocation6 + $0x3f8] ss:$20 sps:$4 sm:$0xff]  }
 0x141   :  { %1329 = vmatpush2.bf16.msra.mxu0 %v2122_v36  ;;  %1370 = vmatpush2.bf16.msra.mxu1 %v2125_v37  ;;  %v2199_v36 = vld [vmem:[#allocation6 + $0x2b8] ss:$20 sps:$4 sm:$0xff]   ;;  %v2200_v37 = vld [vmem:[#allocation6 + $0x3d0] ss:$20 sps:$4 sm:$0xff]  }
 0x142   :  { %1330 = vmatprep.subr.bf16.mxu0 %v2130_v41  ;;  %1371 = vmatprep.subr.bf16.mxu1 %v2133_v44  ;;  %v2201_v41 = vld [vmem:[#allocation6 + $0x290] ss:$20 sps:$4 sm:$0xff]  }
 0x143   :  { %v262_v44 = vld [vmem:[#allocation7 + $0x4] sm:$0xf] }
 0x145   :  { %1331 = vmatpush2.bf16.msra.mxu0 %v2128_v45  ;;  %1372 = vmatpush2.bf16.msra.mxu1 %v2131_v46  ;;  %v573_v45 = vrot.slane %v262_v44, %v301_v39  ;;  %v577_v46 = vrot.slane %v262_v44, %v305_v42  ;;  %v581_v39 = vrot.slane %v262_v44, %v309_v40 }
 0x146   :  { %1332 = vmatprep.subr.bf16.mxu0 %v2136_v47  ;;  %1373 = vmatprep.subr.bf16.mxu1 %v2139_v48  ;;  %v585_v42 = vrot.slane %v262_v44, %v313_v43 }
 0x149   :  { %1333 = vmatpush2.bf16.msra.mxu0 %v2134_v49  ;;  %1374 = vmatpush2.bf16.msra.mxu1 %v2137_v50 }
 0x14a   :  { %1334 = vmatprep.subr.bf16.mxu0 %v2142_v51  ;;  %1375 = vmatprep.subr.bf16.mxu1 %v2145_v52 }
 0x14d   :  { %1335 = vmatpush2.bf16.msra.mxu0 %v2140_v53  ;;  %1376 = vmatpush2.bf16.msra.mxu1 %v2143_v54 }
 0x14e   :  { %1336 = vmatprep.subr.bf16.mxu0 %v2148_v55  ;;  %1377 = vmatprep.subr.bf16.mxu1 %v2151_v56 }
 0x151   :  { %1337 = vmatpush2.bf16.msra.mxu0 %v2146_v57  ;;  %1378 = vmatpush2.bf16.msra.mxu1 %v2149_v58 }
 0x152   :  { %1338 = vmatprep.subr.bf16.mxu0 %v2154_v59  ;;  %1379 = vmatprep.subr.bf16.mxu1 %v2157_v60 }
 0x155   :  { %1339 = vmatpush2.bf16.msra.mxu0 %v2152_v61  ;;  %1380 = vmatpush2.bf16.msra.mxu1 %v2155_v63 }
 0x156   :  { %1340 = vmatprep.subr.bf16.mxu0 %v2160_v0  ;;  %1381 = vmatprep.subr.bf16.mxu1 %v2163_v1 }
 0x159   :  { %1341 = vmatpush2.bf16.msra.mxu0 %v2158_v2  ;;  %1382 = vmatpush2.bf16.msra.mxu1 %v2161_v3 }
 0x15a   :  { %1342 = vmatprep.subr.bf16.mxu0 %v2166_v4  ;;  %1383 = vmatprep.subr.bf16.mxu1 %v2169_v6 }
 0x15d   :  { %1343 = vmatpush2.bf16.msra.mxu0 %v2164_v7  ;;  %1384 = vmatpush2.bf16.msra.mxu1 %v2167_v8 }
 0x15e   :  { %1877 = vmatprep.subr.bf16.mxu0 %v2170_v9  ;;  %1899 = vmatprep.subr.bf16.mxu1 %v2186_v18 }
 0x160   :  { %1345 = vmatmul.mubr.bf16.vlgmr.msra.gmra.mxu0 %v2350_v5  ;;  %1386 = vmatmul.mubr.bf16.vlgmr.msra.gmra.mxu1 %v2348_v62  ;;  %v2179_v5 = vld [vmem:[#allocation6 + $0x88] ss:$20 sps:$4 sm:$0xff]   ;;  %v2189_v62 = vld [vmem:[#allocation6 + $0x380] ss:$20 sps:$4 sm:$0xff]  }
 0x161   :  { %1878 = vmatpush3.bf16.msra.mxu0 %v2171_v10  ;;  %1900 = vmatpush3.bf16.msra.mxu1 %v2187_v19 }
 0x162   :  { %1879 = vmatprep.subr.bf16.mxu0 %v2172_v11  ;;  %1901 = vmatprep.subr.bf16.mxu1 %v2188_v20 }
 0x165   :  { %1880 = vmatpush3.bf16.msra.mxu0 %v2173_v12  ;;  %1902 = vmatpush3.bf16.msra.mxu1 %v2189_v62 }
 0x166   :  { %1881 = vmatprep.subr.bf16.mxu0 %v2174_v13  ;;  %1903 = vmatprep.subr.bf16.mxu1 %v2190_v22 }
 0x169   :  { %1882 = vmatpush3.bf16.msra.mxu0 %v2175_v14  ;;  %1904 = vmatpush3.bf16.msra.mxu1 %v2191_v24 }
 0x16a   :  { %1883 = vmatprep.subr.bf16.mxu0 %v2176_v15  ;;  %1905 = vmatprep.subr.bf16.mxu1 %v2192_v26  ;;  %v1844_v15 = vld [vmem:[#allocation7 + $0x8] ss:$0 sm:$0xff] }
 0x16d   :  { %1884 = vmatpush3.bf16.msra.mxu0 %v2177_v16  ;;  %1906 = vmatpush3.bf16.msra.mxu1 %v2193_v28 }
 0x16e   :  { %1885 = vmatprep.subr.bf16.mxu0 %v2178_v17  ;;  %1907 = vmatprep.subr.bf16.mxu1 %v2194_v30 }
 0x171   :  { %1886 = vmatpush3.bf16.msra.mxu0 %v2179_v5  ;;  %1908 = vmatpush3.bf16.msra.mxu1 %v2195_v32 }
 0x172   :  { %1887 = vmatprep.subr.bf16.mxu0 %v2180_v21  ;;  %1909 = vmatprep.subr.bf16.mxu1 %v2196_v33 }
 0x175   :  { %1888 = vmatpush3.bf16.msra.mxu0 %v2181_v23  ;;  %1910 = vmatpush3.bf16.msra.mxu1 %v2197_v34 }
 0x176   :  { %1889 = vmatprep.subr.bf16.mxu0 %v2182_v25  ;;  %1911 = vmatprep.subr.bf16.mxu1 %v2198_v35 }
 0x179   :  { %1890 = vmatpush3.bf16.msra.mxu0 %v2183_v27  ;;  %1912 = vmatpush3.bf16.msra.mxu1 %v2199_v36 }
 0x17a   :  { %1891 = vmatprep.subr.bf16.mxu0 %v2184_v29  ;;  %1913 = vmatprep.subr.bf16.mxu1 %v2200_v37 }
 0x17d   :  { %1892 = vmatpush3.bf16.msra.mxu0 %v2185_v31  ;;  %1914 = vmatpush3.bf16.msra.mxu1 %v2201_v41 }
 0x1e0   :  { %v1264_v47 = vpop.f32.mrf.mxu0  ;;  %v1305_v48 = vpop.f32.mrf.mxu1 }
 0x1e1   :  { %v1265_v49 = vadd.f32 %v1264_v47, %v573_v45 }
 0x1e2   :  { %v1266_v50 = vpop.f32.mrf.mxu0  ;;  %v1307_v51 = vpop.f32.mrf.mxu1 }
 0x1e3   :  { %v1267_v52 = vadd.f32 %v1266_v50, %v577_v46  ;;  %v1306_v53 = vadd.f32 %v1305_v48, %v1265_v49 }
 0x1e4   :  { %v1268_v54 = vpop.f32.mrf.mxu0  ;;  %v1309_v55 = vpop.f32.mrf.mxu1 }
 0x1e5   :  { %v1308_v56 = vadd.f32 %v1307_v51, %v1267_v52  ;;  %v1394_v60 = vpack.c.bf16 %v1306_v53, %v1306_v53 }
 0x1e6   :  { %v1269_v57 = vpop.f32.mrf.mxu0  ;;  %v1310_v58 = vpop.f32.mrf.mxu1 }
 0x1e7   :  { %v1395_v59 = vpack.c.bf16 %v1308_v56, %v1308_v56 }
 0x1e9   :  { %1628 = vmatprep.mubr.bf16.mxu0 %v1395_v59 }
 0x1ea   :  { %1629 = vmatmul.mubr.bf16.vlgmr.msra.gmra.mxu0 %v1394_v60 }
 0x220   :  { %v1346_v61 = vpop.f32.mrf.mxu0  ;;  %v1387_v63 = vpop.f32.mrf.mxu1 }
 0x221   :  { %v1347_v0 = vadd.f32 %v1346_v61, %v581_v39 }
 0x222   :  { %v1348_v1 = vpop.f32.mrf.mxu0  ;;  %v1389_v2 = vpop.f32.mrf.mxu1 }
 0x223   :  { %v1349_v3 = vadd.f32 %v1348_v1, %v585_v42  ;;  %v1388_v4 = vadd.f32 %v1387_v63, %v1347_v0 }
 0x224   :  { %v1350_v6 = vpop.f32.mrf.mxu0  ;;  %v1391_v7 = vpop.f32.mrf.mxu1 }
 0x225   :  { %v1390_v8 = vadd.f32 %v1389_v2, %v1349_v3  ;;  %v1396_v12 = vpack.c.bf16 %v1388_v4, %v1388_v4 }
 0x226   :  { %v1351_v9 = vpop.f32.mrf.mxu0  ;;  %v1392_v10 = vpop.f32.mrf.mxu1 }
 0x227   :  { %v1397_v11 = vpack.c.bf16 %v1390_v8, %v1390_v8 }
 0x229   :  { %1668 = vmatprep.mubr.bf16.mxu1 %v1397_v11 }
 0x22a   :  { %1669 = vmatmul.mubr.bf16.vlgmr.msra.gmra.mxu1 %v1396_v12 }
 0x2aa   :  { %v1893_v40 = vpop.f32.mrf.mxu0 }
 0x2ac   :  { %v1894_v13 = vpop.f32.mrf.mxu0 }
 0x2ad   :  { %v1895_v14 = vadd.f32 %v1894_v13, %v1893_v40 }
 0x2ae   :  { %v1896_v38 = vpop.f32.mrf.mxu0 }
 0x2af   :  { %v1631_v18 = vadd.f32 %v1895_v14, %v1844_v15 }
 0x2b0   :  { %v1897_v43 = vpop.f32.mrf.mxu0 }
 0x2ea   :  { %v1915_v16 = vpop.f32.mrf.mxu1 }
 0x2ec   :  { %v1916_v17 = vpop.f32.mrf.mxu1 }
 0x2ed   :  { %v1917_v19 = vadd.f32 %v1916_v17, %v1915_v16 }
 0x2ee   :  { %v1918_v20 = vpop.f32.mrf.mxu1 }
 0x2ef   :  { %v1671_v5 = vadd.f32 %v1917_v19, %v1631_v18 }
 0x2f0   :  { %v1919_v62 = vpop.f32.mrf.mxu1 }
 0x2f1   :  { %1676 = vst [vmem:[%s2371_s4] sm:$0xff] %v1671_v5 }
 0x2f2   :  { %1681 = vsyncpa [#allocation3], 1 }
 0x2f3   :  { %1682 = vsyncpa [#allocation5], 1 }
 0x2f4   :  { %1683 = vsyncpa [#allocation8], 1 }

</bundles_post_ra>
